<compile_context>
chip_gen: v5e
topology: v5e:2x2
jax: 0.10.0
libtpu: 0.0.40
codegen_flags: <defaults>
</compile_context>

<pallas_src>
import functools

import jax
import jax.numpy as jnp
from jax.experimental import pallas as pl
from jax.experimental.pallas import tpu as pltpu


def _distill_kernel(vl_ref, vr_ref, *refs, n_from):
    """Per-batch-block distillation edge softmax.

    vl_ref: (n_classes, 1)  folded  alpha * W_logit^T @ w_edge_from_logit
    vr_ref: (hidden,   1)  folded  alpha * W_repr^T  @ w_edge_from_repr
    refs  : n_from logits blocks (1, TB, n_classes),
            n_from reprs  blocks (1, TB, hidden),
            out block (TB, n_from)
    """
    lg_refs = refs[:n_from]
    rp_refs = refs[n_from:2 * n_from]
    out_ref = refs[2 * n_from]

    vl = vl_ref[...]
    vr = vr_ref[...]

    # Per-from edge logits (to-modality term & biases cancel in the softmax).
    cols = []
    for i in range(n_from):
        c = (jnp.dot(lg_refs[i][0], vl, preferred_element_type=jnp.float32)
             + jnp.dot(rp_refs[i][0], vr, preferred_element_type=jnp.float32))
        cols.append(c)                                   # (TB, 1) f32, alpha folded in

    # Softmax over the static from-modalities list (per batch row).
    m = cols[0]
    for c in cols[1:]:
        m = jnp.maximum(m, c)
    exs = [jnp.exp(c - m) for c in cols]
    s = exs[0]
    for e in exs[1:]:
        s = s + e
    inv = pl.reciprocal(s, approx=True)                  # EUP slot
    inv = inv * (2.0 - s * inv)                          # one Newton step -> ~f32 precision
    out_ref[...] = jnp.concatenate([e * inv for e in exs], axis=1)


def distillation_forward(logits, reprs, params, *, to_idx, from_idx, alpha,
                         block_rows=None):
    """logits: (M, B, n_classes), reprs: (M, B, hidden) -> edges: (n_from, B)."""
    del to_idx  # Cancels under softmax shift-invariance; kept for API parity.
    n_mod, batch, n_classes = logits.shape
    hidden = reprs.shape[-1]
    gd = params["W_logit"].shape[0]
    from_idx = tuple(int(i) for i in from_idx)
    n_from = len(from_idx)

    # ---- Fold the surviving part of the linear chain (tiny, one-time) ----
    # softmax_i(alpha * e_i) == softmax_i(alpha * (lg_i @ Wl^T w_fr_l + rp_i @ Wr^T w_fr_r))
    we = params["W_edge"].reshape(4 * gd).astype(jnp.float32)
    w_fr_l = we[2 * gd:3 * gd]
    w_fr_r = we[3 * gd:4 * gd]
    v_l = (alpha * (params["W_logit"].astype(jnp.float32).T @ w_fr_l)).reshape(n_classes, 1)
    v_r = (alpha * (params["W_repr"].astype(jnp.float32).T @ w_fr_r)).reshape(hidden, 1)
    # Keep activations in their native dtype on the MXU (f32 accumulate via
    # preferred_element_type).  NOTE: with bf16 activations the folded vectors
    # get quantized to bf16 too; widen tolerances accordingly.
    v_l = v_l.astype(logits.dtype)
    v_r = v_r.astype(reprs.dtype)

    # ---- Batch tile: biggest block whose double-buffered inputs stay well ----
    # ---- inside the v5e 16 MiB scoped-VMEM default (ample on v6e/v7x).     ----
    if block_rows is None:
        row_bytes = n_from * (n_classes * logits.dtype.itemsize
                              + hidden * reprs.dtype.itemsize)
        cap = max(8, ((12 << 20) // (2 * max(row_bytes, 1))) // 8 * 8)
        block_rows = min(512, cap)
    tb = batch if batch <= block_rows else int(block_rows)
    if tb < batch and tb % 8:
        tb = max(8, (tb // 8) * 8)          # sublane-aligned; ragged last block is OK
    nb = pl.cdiv(batch, tb)

    def act_spec(fi, feat):
        # Selects only from-modality `fi`'s row block -> no DMA of other modalities.
        return pl.BlockSpec((1, tb, feat), lambda b: (fi, b, 0))

    def vec_spec(feat):
        return pl.BlockSpec((feat, 1), lambda b: (0, 0))

    kernel = functools.partial(_distill_kernel, n_from=n_from)

    out = pl.pallas_call(
        kernel,
        out_shape=jax.ShapeDtypeStruct((batch, n_from), jnp.float32),
        grid=(nb,),
        in_specs=([vec_spec(n_classes), vec_spec(hidden)]
                  + [act_spec(fi, n_classes) for fi in from_idx]
                  + [act_spec(fi, hidden) for fi in from_idx]),
        out_specs=pl.BlockSpec((tb, n_from), lambda b: (b, 0)),
        compiler_params=pltpu.CompilerParams(dimension_semantics=("parallel",)),
    )(v_l, v_r, *([logits] * n_from), *([reprs] * n_from))

    # Final transpose of the tiny (B, n_from) result is left to XLA.
    return out.T  # (n_from, B), matching edges.transpose(0, 1) in PyTorch


def reference_forward(logits, reprs, params, *, to_idx, from_idx, alpha):
    """Pure-JAX reference mirroring the PyTorch forward exactly (no folding)."""
    n_mod, batch, _ = logits.shape
    gd = params["W_logit"].shape[0]
    zl = logits.reshape(n_mod * batch, -1) @ params["W_logit"].T + params["b_logit"]
    zr = reprs.reshape(n_mod * batch, -1) @ params["W_repr"].T + params["b_repr"]
    z = jnp.concatenate([zl, zr], axis=1).reshape(n_mod, batch, 2 * gd)
    edges = []
    for i in from_idx:
        x = jnp.concatenate([z[to_idx], z[i]], axis=1)
        edges.append(x @ params["W_edge"].T + params["b_edge"])
    edges = jnp.concatenate(edges, axis=1)
    return jax.nn.softmax(edges * alpha, axis=1).T


def init_params(key, n_classes, hidden_size, gd_size):
    """Deterministic synthetic params, PyTorch nn.Linear-style uniform init."""
    ks = jax.random.split(key, 6)

    def lin(kw, kb, fan_in, fan_out):
        bound = 1.0 / jnp.sqrt(jnp.float32(fan_in))
        w = jax.random.uniform(kw, (fan_out, fan_in), jnp.float32, -bound, bound)
        b = jax.random.uniform(kb, (fan_out,), jnp.float32, -bound, bound)
        return w, b

    wl, bl = lin(ks[0], ks[1], n_classes, gd_size)
    wr, br = lin(ks[2], ks[3], hidden_size, gd_size)
    we, be = lin(ks[4], ks[5], gd_size * 4, 1)
    return {"W_logit": wl, "b_logit": bl,
            "W_repr": wr, "b_repr": br,
            "W_edge": we, "b_edge": be}


# TODO(synk): distillation_loss (regularization + distance-metric losses) is a
# training-only helper depending on external `utils.distance_metric`; not part of forward.

if __name__ == "__main__":
    n_modalities, batch_size = 3, 24
    n_classes, hidden_size, gd_size = 16, 32, 16
    to_idx, from_idx, alpha = 0, (1, 2), 4.0

    key = jax.random.PRNGKey(0)
    k_log, k_rep, k_par = jax.random.split(key, 3)
    logits = jax.random.normal(k_log, (n_modalities, batch_size, n_classes), jnp.float32)
    reprs = jax.random.normal(k_rep, (n_modalities, batch_size, hidden_size), jnp.float32)
    params = init_params(k_par, n_classes, hidden_size, gd_size)

    ref = reference_forward(logits, reprs, params,
                            to_idx=to_idx, from_idx=from_idx, alpha=alpha)

    # Single-block path (auto block size).
    edges = distillation_forward(logits, reprs, params,
                                 to_idx=to_idx, from_idx=from_idx, alpha=alpha)
    edges = jax.block_until_ready(edges)
    assert edges.shape == (len(from_idx), batch_size), edges.shape
    assert jnp.allclose(edges, ref, atol=3e-5, rtol=3e-5), (edges, ref)

    # Multi-block pipelined path (3 batch tiles of 8 rows).
    edges_tiled = distillation_forward(logits, reprs, params, to_idx=to_idx,
                                       from_idx=from_idx, alpha=alpha, block_rows=8)
    edges_tiled = jax.block_until_ready(edges_tiled)
    assert jnp.allclose(edges_tiled, ref, atol=3e-5, rtol=3e-5), (edges_tiled, ref)

    print("KERNEL_OK")
</pallas_src>

<mosaic_0001>
module attributes {stable_mosaic.version = 11 : i64} {
  func.func @_distill_kernel(%arg0: i32, %arg1: memref<16x1xf32, #tpu.memory_space<vmem>>, %arg2: memref<32x1xf32, #tpu.memory_space<vmem>>, %arg3: memref<1x24x16xf32, #tpu.memory_space<vmem>>, %arg4: memref<1x24x16xf32, #tpu.memory_space<vmem>>, %arg5: memref<1x24x32xf32, #tpu.memory_space<vmem>>, %arg6: memref<1x24x32xf32, #tpu.memory_space<vmem>>, %arg7: memref<24x2xf32, #tpu.memory_space<vmem>>) attributes {dimension_semantics = [#tpu.dimension_semantics<parallel>], iteration_bounds = array<i64: 1>, scalar_prefetch = 0 : i64, scratch_operands = 0 : i64, tpu.core_type = #tpu.core_type<tc>, window_params = [{pipeline_mode = #tpu.pipeline_mode<synchronous>, transform_indices = @transform_0, window_bounds = array<i64: 16, 1>}, {pipeline_mode = #tpu.pipeline_mode<synchronous>, transform_indices = @transform_1, window_bounds = array<i64: 32, 1>}, {transform_indices = @transform_2, window_bounds = array<i64: 1, 24, 16>}, {transform_indices = @transform_3, window_bounds = array<i64: 1, 24, 16>}, {transform_indices = @transform_4, window_bounds = array<i64: 1, 24, 32>}, {transform_indices = @transform_5, window_bounds = array<i64: 1, 24, 32>}, {transform_indices = @transform_6, window_bounds = array<i64: 24, 2>}]} {
    %c0 = arith.constant 0 : index
    %c0_0 = arith.constant 0 : index
    %0 = vector.load %arg1[%c0, %c0_0] : memref<16x1xf32, #tpu.memory_space<vmem>>, vector<16x1xf32>
    %c0_1 = arith.constant 0 : index
    %c0_2 = arith.constant 0 : index
    %1 = vector.load %arg2[%c0_1, %c0_2] : memref<32x1xf32, #tpu.memory_space<vmem>>, vector<32x1xf32>
    %c0_3 = arith.constant 0 : index
    %c0_4 = arith.constant 0 : index
    %c0_5 = arith.constant 0 : index
    %2 = vector.load %arg3[%c0_3, %c0_4, %c0_5] : memref<1x24x16xf32, #tpu.memory_space<vmem>>, vector<1x24x16xf32>
    %3 = vector.shape_cast %2 : vector<1x24x16xf32> to vector<24x16xf32>
    %cst = arith.constant dense<0.000000e+00> : vector<24x1xf32>
    %4 = tpu.matmul %3, %0, %cst {dimension_numbers = #tpu.dot_dimension_numbers<[1], [0], [0], [1], [0, 0, 1, 1], [], []>} : vector<24x16xf32>, vector<16x1xf32>, vector<24x1xf32> -> vector<24x1xf32>
    %c0_6 = arith.constant 0 : index
    %c0_7 = arith.constant 0 : index
    %c0_8 = arith.constant 0 : index
    %5 = vector.load %arg5[%c0_6, %c0_7, %c0_8] : memref<1x24x32xf32, #tpu.memory_space<vmem>>, vector<1x24x32xf32>
    %6 = vector.shape_cast %5 : vector<1x24x32xf32> to vector<24x32xf32>
    %cst_9 = arith.constant dense<0.000000e+00> : vector<24x1xf32>
    %7 = tpu.matmul %6, %1, %cst_9 {dimension_numbers = #tpu.dot_dimension_numbers<[1], [0], [0], [1], [0, 0, 1, 1], [], []>} : vector<24x32xf32>, vector<32x1xf32>, vector<24x1xf32> -> vector<24x1xf32>
    %8 = arith.addf %4, %7 : vector<24x1xf32>
    %c0_10 = arith.constant 0 : index
    %c0_11 = arith.constant 0 : index
    %c0_12 = arith.constant 0 : index
    %9 = vector.load %arg4[%c0_10, %c0_11, %c0_12] : memref<1x24x16xf32, #tpu.memory_space<vmem>>, vector<1x24x16xf32>
    %10 = vector.shape_cast %9 : vector<1x24x16xf32> to vector<24x16xf32>
    %cst_13 = arith.constant dense<0.000000e+00> : vector<24x1xf32>
    %11 = tpu.matmul %10, %0, %cst_13 {dimension_numbers = #tpu.dot_dimension_numbers<[1], [0], [0], [1], [0, 0, 1, 1], [], []>} : vector<24x16xf32>, vector<16x1xf32>, vector<24x1xf32> -> vector<24x1xf32>
    %c0_14 = arith.constant 0 : index
    %c0_15 = arith.constant 0 : index
    %c0_16 = arith.constant 0 : index
    %12 = vector.load %arg6[%c0_14, %c0_15, %c0_16] : memref<1x24x32xf32, #tpu.memory_space<vmem>>, vector<1x24x32xf32>
    %13 = vector.shape_cast %12 : vector<1x24x32xf32> to vector<24x32xf32>
    %cst_17 = arith.constant dense<0.000000e+00> : vector<24x1xf32>
    %14 = tpu.matmul %13, %1, %cst_17 {dimension_numbers = #tpu.dot_dimension_numbers<[1], [0], [0], [1], [0, 0, 1, 1], [], []>} : vector<24x32xf32>, vector<32x1xf32>, vector<24x1xf32> -> vector<24x1xf32>
    %15 = arith.addf %11, %14 : vector<24x1xf32>
    %16 = arith.maximumf %8, %15 : vector<24x1xf32>
    %17 = arith.subf %8, %16 : vector<24x1xf32>
    %18 = math.exp %17 : vector<24x1xf32>
    %19 = arith.subf %15, %16 : vector<24x1xf32>
    %20 = math.exp %19 : vector<24x1xf32>
    %21 = arith.addf %18, %20 : vector<24x1xf32>
    %22 = tpu.reciprocal %21 {approx = true} : vector<24x1xf32> -> vector<24x1xf32>
    %23 = arith.mulf %21, %22 : vector<24x1xf32>
    %cst_18 = arith.constant 2.000000e+00 : f32
    %24 = vector.broadcast %cst_18 : f32 to vector<24x1xf32>
    %25 = arith.subf %24, %23 : vector<24x1xf32>
    %26 = arith.mulf %22, %25 : vector<24x1xf32>
    %27 = arith.mulf %18, %26 : vector<24x1xf32>
    %28 = arith.mulf %20, %26 : vector<24x1xf32>
    %29 = tpu.concatenate %27, %28 in 1 : vector<24x1xf32>, vector<24x1xf32> -> vector<24x2xf32>
    %c0_19 = arith.constant 0 : index
    %c0_20 = arith.constant 0 : index
    %30 = vector.load %arg7[%c0_19, %c0_20] : memref<24x2xf32, #tpu.memory_space<vmem>>, vector<24x2xf32>
    tpu.vector_store %arg7[%c0_19, %c0_20], %29 {strides = array<i32>} : memref<24x2xf32, #tpu.memory_space<vmem>>, vector<24x2xf32>,
    return
  }
  func.func @transform_0(%arg0: i32) -> (i32, i32) {
    %c0_i32 = arith.constant 0 : i32
    %c0_i32_0 = arith.constant 0 : i32
    %c0_i32_1 = arith.constant 0 : i32
    return %c0_i32, %c0_i32_0 : i32, i32
  }
  func.func @transform_1(%arg0: i32) -> (i32, i32) {
    %c0_i32 = arith.constant 0 : i32
    %c0_i32_0 = arith.constant 0 : i32
    %c0_i32_1 = arith.constant 0 : i32
    return %c0_i32, %c0_i32_0 : i32, i32
  }
  func.func @transform_2(%arg0: i32) -> (i32, i32, i32) {
    %c1_i32 = arith.constant 1 : i32
    %c0_i32 = arith.constant 0 : i32
    %c0_i32_0 = arith.constant 0 : i32
    return %c1_i32, %arg0, %c0_i32 : i32, i32, i32
  }
  func.func @transform_3(%arg0: i32) -> (i32, i32, i32) {
    %c2_i32 = arith.constant 2 : i32
    %c0_i32 = arith.constant 0 : i32
    %c0_i32_0 = arith.constant 0 : i32
    return %c2_i32, %arg0, %c0_i32 : i32, i32, i32
  }
  func.func @transform_4(%arg0: i32) -> (i32, i32, i32) {
    %c1_i32 = arith.constant 1 : i32
    %c0_i32 = arith.constant 0 : i32
    %c0_i32_0 = arith.constant 0 : i32
    return %c1_i32, %arg0, %c0_i32 : i32, i32, i32
  }
  func.func @transform_5(%arg0: i32) -> (i32, i32, i32) {
    %c2_i32 = arith.constant 2 : i32
    %c0_i32 = arith.constant 0 : i32
    %c0_i32_0 = arith.constant 0 : i32
    return %c2_i32, %arg0, %c0_i32 : i32, i32, i32
  }
  func.func @transform_6(%arg0: i32) -> (i32, i32) {
    %c0_i32 = arith.constant 0 : i32
    %c0_i32_0 = arith.constant 0 : i32
    return %arg0, %c0_i32 : i32, i32
  }
}

</mosaic_0001>

<bundles_post_ra>
// kernel: tpu_custom_call.1
= control target key start
LH: loop header
LB: loop body
LE: loop exit
PB: predicated region body
PF: predicated region fallthrough
CT: control target
= control target key end

     0   :  { %vm83_vm0 = vcmask 130048   ;;  %vm47_vm1 = vcmask 261120   ;;  %vm249_vm2 = vcmask 7168   ;;  %vm253_vm3 = vcmask 15360   ;;  %s415_s1 = inlined_call_operand.vmem [shape: f32[32,1], index: 1, kind: input, shape index: {}]   ;;  %s416_s0 = inlined_call_operand.vmem [shape: f32[16,1], index: 0, kind: input, shape index: {}]   ;;  %s417_s3 = inlined_call_operand.vmem [shape: f32[3,24,16], index: 3, kind: input, shape index: {}]   ;;  %s418_s2 = inlined_call_operand.vmem [shape: f32[3,24,16], index: 2, kind: input, shape index: {}]   ;;  %s419_s5 = inlined_call_operand.vmem [shape: f32[3,24,32], index: 5, kind: input, shape index: {}]   ;;  %s420_s4 = inlined_call_operand.vmem [shape: f32[3,24,32], index: 4, kind: input, shape index: {}]   ;;  %s421_s6 = inlined_call_operand.vmem [shape: f32[24,2], index: 6, kind: output, shape index: {}]  }
   0x1   :  { %v40_v0 = vld [vmem:[%s415_s1 + $0x18] sm:$0xff]  ;;  %v39_v1 = vld [vmem:[%s415_s1 + $0x10] sm:$0xff]  ;;  %v36_v2 = vld [vmem:[%s416_s0 + $0x8] sm:$0xff] }
   0x2   :  { %146 = vmatpush.msra.mxu2 %v40_v0  ;;  %69 = vmatpush.msra.mxu0 %v40_v0  ;;  %v35_v3 = vld [vmem:[%s416_s0] sm:$0xff]  ;;  %v38_v4 = vld [vmem:[%s415_s1 + $0x8] sm:$0xff]  ;;  %v273_v5 = vld [vmem:[%s417_s3 + $0x30] sm:$0xff] }
   0x3   :  { %183 = vmatpush.msra.mxu3 %v36_v2  ;;  %107 = vmatpush.msra.mxu1 %v36_v2  ;;  %v261_v6 = vld [vmem:[%s418_s2 + $0x18] sm:$0xff]  ;;  %v37_v7 = vld [vmem:[%s415_s1] sm:$0xff]  ;;  %v276_v8 = vld [vmem:[%s419_s5 + $0x30] sm:$0xff] }
   0x4   :  { %147 = vmatpush.msra.mxu2 %v39_v1  ;;  %70 = vmatpush.msra.mxu0 %v39_v1  ;;  %v264_v9 = vld [vmem:[%s420_s4 + $0x18] sm:$0xff]  ;;  %v262_v11 = vld [vmem:[%s418_s2 + $0x20] sm:$0xff]  ;;  %v263_v15 = vld [vmem:[%s418_s2 + $0x28] sm:$0xff]  ;;  %s304_s2 = smov 1  }
   0x5   :  { %184 = vmatpush.msra.mxu3 %v35_v3  ;;  %108 = vmatpush.msra.mxu1 %v35_v3  ;;  %v274_v10 = vld [vmem:[%s417_s3 + $0x38] sm:$0xff]  ;;  %v265_v13 = vld [vmem:[%s420_s4 + $0x20] sm:$0xff]  ;;  %v266_v17 = vld [vmem:[%s420_s4 + $0x28] sm:$0xff] }
   0x6   :  { %148 = vmatpush.msra.mxu2 %v38_v4  ;;  %282 = vmatmul.msk.f32.vlgmr.msra.gmra.mxu3 %vm83_vm0, %v273_v5  ;;  %v277_v12 = vld [vmem:[%s419_s5 + $0x38] sm:$0xff]  ;;  %v275_v14 = vld [vmem:[%s417_s3 + $0x40] sm:$0xff] }
   0x7   :  { %71 = vmatpush.msra.mxu0 %v38_v4  ;;  %270 = vmatmul.msk.f32.vlgmr.msra.gmra.mxu1 %vm83_vm0, %v261_v6  ;;  %v278_v16 = vld [vmem:[%s419_s5 + $0x40] sm:$0xff] }
   0x8   :  { %149 = vmatpush.msra.mxu2 %v37_v7 }
   0x9   :  { %279 = vmatmul.msk.f32.vlgmr.msra.gmra.mxu2 %vm47_vm1, %v276_v8  ;;  %72 = vmatpush.msra.mxu0 %v37_v7 }
   0xa   :  { %267 = vmatmul.msk.f32.vlgmr.msra.gmra.mxu0 %vm47_vm1, %v264_v9 }
   0xe   :  { %283 = vmatmul.msk.f32.gmra.mxu3 %vm83_vm0, %v274_v10 }
   0xf   :  { %271 = vmatmul.msk.f32.gmra.mxu1 %vm83_vm0, %v262_v11 }
  0x11   :  { %280 = vmatmul.msk.f32.gmra.mxu2 %vm47_vm1, %v277_v12 }
  0x12   :  { %268 = vmatmul.msk.f32.gmra.mxu0 %vm47_vm1, %v265_v13 }
  0x16   :  { %284 = vmatmul.msk.f32.gmra.mxu3 %vm83_vm0, %v275_v14 }
  0x17   :  { %272 = vmatmul.msk.f32.gmra.mxu1 %vm83_vm0, %v263_v15 }
  0x19   :  { %281 = vmatmul.msk.f32.gmra.mxu2 %vm47_vm1, %v278_v16 }
  0x1a   :  { %269 = vmatmul.msk.f32.gmra.mxu0 %vm47_vm1, %v266_v17 }
  0x84   :  { %v110_v18 = vpop.f32.mrf.mxu1 }
  0x87   :  { %v74_v19 = vpop.f32.mrf.mxu0 }
  0x88   :  { %v111_v21 = vadd.f32 %v110_v18, %v74_v19 }
  0x89   :  { %v186_v20 = vpop.f32.mrf.mxu3 }
  0x8c   :  { %v151_v22 = vpop.f32.mrf.mxu2  ;;  %v113_v24 = vpop.f32.mrf.mxu1 }
  0x8d   :  { %v187_v23 = vadd.f32 %v186_v20, %v151_v22 }
  0x8f   :  { %v195_v25 = vmax.f32 %v111_v21, %v187_v23  ;;  %v77_v26 = vpop.f32.mrf.mxu0 }
  0x90   :  { %v114_v32 = vadd.f32 %v113_v24, %v77_v26 }
  0x91   :  { %v198_v27 = vsub.f32 %v111_v21, %v195_v25  ;;  %v207_v28 = vsub.f32 %v187_v23, %v195_v25  ;;  %v189_v29 = vpop.f32.mrf.mxu3 }
  0x93   :  { %v201_v30 = vmul.f32 1.442695, %v198_v27  ;;  %v210_v31 = vmul.f32 1.442695, %v207_v28 }
  0x94   :  { %v154_v33 = vpop.f32.mrf.mxu2  ;;  %v116_v37 = vpop.f32.mrf.mxu1 }
  0x95   :  { %286 = vpow2.f32 %v201_v30  ;;  %v190_v34 = vadd.f32 %v189_v29, %v154_v33 }
  0x96   :  { %288 = vpow2.f32 %v210_v31 }
  0x97   :  { %v196_v35 = vmax.f32 %v114_v32, %v190_v34  ;;  %v80_v36 = vpop.f32.mrf.mxu0 }
  0x98   :  { %v117_v44 = vadd.f32 %v116_v37, %v80_v36 }
  0x99   :  { %v199_v38 = vsub.f32 %v114_v32, %v196_v35  ;;  %v208_v39 = vsub.f32 %v190_v34, %v196_v35  ;;  %v192_v40 = vpop.f32.mrf.mxu3 }
  0x9b   :  { %v287_v41 = vpop.eup %286  ;;  %v203_v42 = vmul.f32 1.442695, %v199_v38  ;;  %v212_v43 = vmul.f32 1.442695, %v208_v39 }
  0x9c   :  { %v289_v45 = vpop.eup %288  ;;  %v157_v46 = vpop.f32.mrf.mxu2 }
  0x9d   :  { %290 = vpow2.f32 %v203_v42  ;;  %v193_v47 = vadd.f32 %v192_v40, %v157_v46  ;;  %v216_v48 = vadd.f32 %v289_v45, %v287_v41 }
  0x9e   :  { %292 = vpow2.f32 %v212_v43 }
  0x9f   :  { %v197_v49 = vmax.f32 %v117_v44, %v193_v47  ;;  %294 = vrcp.f32 %v216_v48 }
  0xa1   :  { %v200_v50 = vsub.f32 %v117_v44, %v197_v49  ;;  %v209_v51 = vsub.f32 %v193_v47, %v197_v49 }
  0xa3   :  { %v291_v52 = vpop.eup %290  ;;  %v205_v53 = vmul.f32 1.442695, %v200_v50  ;;  %v214_v54 = vmul.f32 1.442695, %v209_v51 }
  0xa4   :  { %v293_v55 = vpop.eup %292 }
  0xa5   :  { %v295_v56 = vpop.eup %294  ;;  %296 = vpow2.f32 %v205_v53  ;;  %v217_v57 = vadd.f32 %v293_v55, %v291_v52 }
  0xa6   :  { %298 = vpow2.f32 %v214_v54  ;;  %v222_v58 = vmul.f32 %v295_v56, %v216_v48 }
  0xa7   :  { %300 = vrcp.f32 %v217_v57 }
  0xa8   :  { %v225_v59 = vsub.f32 2.0, %v222_v58 }
  0xaa   :  { %v228_v60 = vmul.f32 %v295_v56, %v225_v59 }
  0xab   :  { %v297_v61 = vpop.eup %296 }
  0xac   :  { %v299_v62 = vpop.eup %298  ;;  %v234_v63 = vmul.f32 %v289_v45, %v228_v60  ;;  %v231_v0 = vmul.f32 %v287_v41, %v228_v60 }
  0xad   :  { %v301_v1 = vpop.eup %300  ;;  %v218_v2 = vadd.f32 %v299_v62, %v297_v61 }
  0xae   :  { %240 = vrot.lane.b32.xlu0 %v234_v63, %s304_s2  ;;  %v223_v3 = vmul.f32 %v301_v1, %v217_v57 }
  0xaf   :  { %302 = vrcp.f32 %v218_v2 }
  0xb0   :  { %v226_v4 = vsub.f32 2.0, %v223_v3 }
  0xb2   :  { %v229_v5 = vmul.f32 %v301_v1, %v226_v4 }
  0xb4   :  { %v235_v6 = vmul.f32 %v293_v55, %v229_v5  ;;  %v232_v7 = vmul.f32 %v291_v52, %v229_v5 }
  0xb5   :  { %v303_v8 = vpop.eup %302 }
  0xb6   :  { %242 = vrot.lane.b32.xlu0 %v235_v6, %s304_s2  ;;  %v224_v9 = vmul.f32 %v303_v8, %v218_v2 }
  0xb8   :  { %v227_v10 = vsub.f32 2.0, %v224_v9 }
  0xba   :  { %v230_v11 = vmul.f32 %v303_v8, %v227_v10 }
  0xbc   :  { %v236_v12 = vmul.f32 %v299_v62, %v230_v11  ;;  %v233_v13 = vmul.f32 %v297_v61, %v230_v11 }
  0xbe   :  { %244 = vrot.lane.b32.xlu1 %v236_v12, %s304_s2 }
 0x120   :  { %v241_v14 = vpop.permute.xlu0 %240 }
 0x121   :  { %v250_v15 = vsel %vm249_vm2, %v231_v0, %v241_v14 }
 0x122   :  { %254 = vst.msk [vmem:[%s421_s6] sm:$0xff] %vm253_vm3, %v250_v15 }
 0x128   :  { %v243_v16 = vpop.permute.xlu0 %242 }
 0x129   :  { %v251_v17 = vsel %vm249_vm2, %v232_v7, %v243_v16 }
 0x12a   :  { %255 = vst.msk [vmem:[%s421_s6 + $0x8] sm:$0xff] %vm253_vm3, %v251_v17 }
 0x130   :  { %v245_v18 = vpop.permute.xlu1 %244 }
 0x131   :  { %v252_v19 = vsel %vm249_vm2, %v233_v13, %v245_v18 }
 0x132   :  { %256 = vst.msk [vmem:[%s421_s6 + $0x10] sm:$0xff] %vm253_vm3, %v252_v19 }

</bundles_post_ra>
